<compile_context>
chip_gen: v7x
topology: tpu7x:2x2x1
jax: 0.10.0
libtpu: 0.0.40
codegen_flags: <defaults>
</compile_context>

<pallas_src>
import jax
import jax.numpy as jnp
from jax import lax
from jax.experimental import pallas as pl
from jax.experimental.pallas import tpu as pltpu


# Contract dim 1 of the x tile (tm, tk) with dim 1 of the w tile (tn, tk)
# -> (tm, tn).  This lets the kernel eat the PyTorch (out_dim, in_dim)
# weight layout directly, so we never materialize weight.T in HBM.
_DN = (((1,), (1,)), ((), ()))

_SINGLE_BLOCK_BYTES = 4 * 1024 * 1024  # dispatch threshold for the tiny path


def _round_up(v, m):
    return ((v + m - 1) // m) * m


def _matmul_noacc_kernel(x_ref, w_ref, o_ref):
    # Used for grid=() (whole-problem-in-VMEM) and for the tiled path when
    # the K axis collapses to a single step (no accumulator needed).
    o_ref[...] = lax.dot_general(
        x_ref[...], w_ref[...], _DN, preferred_element_type=jnp.float32
    ).astype(o_ref.dtype)


def _matmul_acc_kernel(x_ref, w_ref, o_ref, acc_ref):
    # Grid = (M//tm, N//tn, K//tk); K (axis 2) is the reduction axis.
    @pl.when(pl.program_id(2) == 0)
    def _():
        acc_ref[...] = jnp.zeros_like(acc_ref)

    acc_ref[...] += lax.dot_general(
        x_ref[...], w_ref[...], _DN, preferred_element_type=jnp.float32
    )

    @pl.when(pl.program_id(2) == pl.num_programs(2) - 1)
    def _():
        o_ref[...] = acc_ref[...].astype(o_ref.dtype)


def _pick_tiles(M, N, K):
    """Big, generation-friendly tiles, VMEM-budgeted (<~14 MiB double-buffered)."""
    # K: collapse the reduction to one step when in_dim is modest (drops the
    # accumulator, the init/finalize phases, and x-tile re-fetches).
    if K <= 2048:
        tk = _round_up(K, 128)
    else:
        tk = 1024
    # N: lane-dense output, multiple of 128, up to 512 wide (unmasked vst).
    tn = min(512, _round_up(N, 128))
    # M: multiple of 8 (sublane), up to 256 (fills the 256-wide MXU halves on
    # v6e/v7x, 128-aligned for v5e); bigger tm cuts weight re-fetches.
    tm = min(256, _round_up(M, 8))
    return tm, tn, tk


def _tiled_matmul(x2d, weight, M, N, K):
    tm, tn, tk = _pick_tiles(M, N, K)
    M_pad = _round_up(M, tm)
    N_pad = _round_up(N, tn)
    K_pad = _round_up(K, tk)

    # Zero-pad so every block is full: zero K columns contribute nothing to
    # the reduction; padded M rows / N cols are sliced off afterwards.
    xp = x2d
    if (M_pad, K_pad) != (M, K):
        xp = jnp.pad(x2d, ((0, M_pad - M), (0, K_pad - K)))
    wp = weight
    if (N_pad, K_pad) != (N, K):
        wp = jnp.pad(weight, ((0, N_pad - N), (0, K_pad - K)))

    grid = (M_pad // tm, N_pad // tn, K_pad // tk)
    nk = grid[2]

    if nk == 1:
        kernel = _matmul_noacc_kernel
        scratch = []
    else:
        kernel = _matmul_acc_kernel
        scratch = [pltpu.VMEM((tm, tn), jnp.float32)]

    yp = pl.pallas_call(
        kernel,
        out_shape=jax.ShapeDtypeStruct((M_pad, N_pad), x2d.dtype),
        grid_spec=pltpu.PrefetchScalarGridSpec(
            num_scalar_prefetch=0,
            grid=grid,
            in_specs=[
                pl.BlockSpec((tm, tk), lambda i, j, k: (i, k)),
                # weight stays (out_dim, in_dim): block indexed by (j, k).
                pl.BlockSpec((tn, tk), lambda i, j, k: (j, k)),
            ],
            out_specs=pl.BlockSpec((tm, tn), lambda i, j, k: (i, j)),
            scratch_shapes=scratch,
        ),
        compiler_params=pltpu.CompilerParams(
            dimension_semantics=("parallel", "parallel", "arbitrary"),
            # Within v7x's 64 MiB physical VMEM with headroom; raises the
            # 16/32 MiB scoped defaults on v5e/v6e for the bigger tiles.
            vmem_limit_bytes=48 * 1024 * 1024,
        ),
    )(xp, wp)

    if (M_pad, N_pad) != (M, N):
        yp = yp[:M, :N]
    return yp


@jax.jit
def linear_projection(x, weight):
    """y = x @ weight.T  (weight: (out_dim, in_dim), bias-free nn.Linear)."""
    *lead, in_dim = x.shape
    out_dim, in_dim_w = weight.shape
    assert in_dim == in_dim_w, (in_dim, in_dim_w)
    M = 1
    for d in lead:
        M *= d

    x2d = x.reshape(M, in_dim)

    total_bytes = (
        M * in_dim + out_dim * in_dim + M * out_dim
    ) * jnp.dtype(x.dtype).itemsize

    if total_bytes <= _SINGLE_BLOCK_BYTES:
        # Whole problem fits comfortably in VMEM: single block, grid=(),
        # no per-grid-step overhead, no padding, no accumulator.
        y2d = pl.pallas_call(
            _matmul_noacc_kernel,
            out_shape=jax.ShapeDtypeStruct((M, out_dim), x.dtype),
        )(x2d, weight)
    else:
        y2d = _tiled_matmul(x2d, weight, M, out_dim, in_dim)

    return y2d.reshape(*lead, out_dim)


if __name__ == "__main__":
    key = jax.random.PRNGKey(0)
    kx, kw, kx2, kw2 = jax.random.split(key, 4)

    # --- Small case (matches the module's typical use; single-block path) ---
    batch, seq = 2, 8
    in_dim, out_dim = 256, 128
    x = jax.random.normal(kx, (batch, seq, in_dim), dtype=jnp.float32)
    # Deterministic nn.Linear-style init: U(-1/sqrt(in_dim), 1/sqrt(in_dim)),
    # weight shape (out_dim, in_dim) as in PyTorch.
    bound = 1.0 / jnp.sqrt(jnp.float32(in_dim))
    weight = jax.random.uniform(
        kw, (out_dim, in_dim), dtype=jnp.float32, minval=-bound, maxval=bound
    )

    y = linear_projection(x, weight)
    jax.block_until_ready(y)
    y_ref = jnp.einsum("bsd,od->bso", x, weight)
    assert y.shape == (batch, seq, out_dim), y.shape
    assert jnp.allclose(y, y_ref, atol=1e-5, rtol=1e-5), float(
        jnp.max(jnp.abs(y - y_ref))
    )

    # --- Larger, non-divisible case (exercises tiled path + padding + K acc) ---
    b2, s2 = 4, 130          # M = 520 (not a multiple of the 256-row tile)
    in2, out2 = 3000, 1000   # K and N not multiples of 1024 / 512
    x_big = jax.random.normal(kx2, (b2, s2, in2), dtype=jnp.float32)
    bound2 = 1.0 / jnp.sqrt(jnp.float32(in2))
    w_big = jax.random.uniform(
        kw2, (out2, in2), dtype=jnp.float32, minval=-bound2, maxval=bound2
    )

    y_big = linear_projection(x_big, w_big)
    jax.block_until_ready(y_big)
    y_big_ref = jnp.einsum(
        "bsd,od->bso", x_big, w_big, precision=jax.lax.Precision.HIGHEST
    )
    assert y_big.shape == (b2, s2, out2), y_big.shape
    assert jnp.allclose(y_big, y_big_ref, atol=1e-2, rtol=1e-2), float(
        jnp.max(jnp.abs(y_big - y_big_ref))
    )

    print("KERNEL_OK")
</pallas_src>

<mosaic_0001>
module attributes {stable_mosaic.version = 11 : i64} {
  func.func @_matmul_noacc_kernel(%arg0: memref<16x256xf32, #tpu.memory_space<vmem>>, %arg1: memref<128x256xf32, #tpu.memory_space<vmem>>, %arg2: memref<16x128xf32, #tpu.memory_space<vmem>>) attributes {dimension_semantics = [], scalar_prefetch = 0 : i64, scratch_operands = 0 : i64, tpu.core_type = #tpu.core_type<tc>} {
    %c0 = arith.constant 0 : index
    %c0_0 = arith.constant 0 : index
    %0 = vector.load %arg0[%c0, %c0_0] : memref<16x256xf32, #tpu.memory_space<vmem>>, vector<16x256xf32>
    %c0_1 = arith.constant 0 : index
    %c0_2 = arith.constant 0 : index
    %1 = vector.load %arg1[%c0_1, %c0_2] : memref<128x256xf32, #tpu.memory_space<vmem>>, vector<128x256xf32>
    %cst = arith.constant dense<0.000000e+00> : vector<16x128xf32>
    %2 = tpu.matmul %0, %1, %cst {dimension_numbers = #tpu.dot_dimension_numbers<[1], [1], [0], [0], [0, 0, 1, 0], [], []>} : vector<16x256xf32>, vector<128x256xf32>, vector<16x128xf32> -> vector<16x128xf32>
    %c0_3 = arith.constant 0 : index
    %c0_4 = arith.constant 0 : index
    %3 = vector.load %arg2[%c0_3, %c0_4] : memref<16x128xf32, #tpu.memory_space<vmem>>, vector<16x128xf32>
    tpu.vector_store %arg2[%c0_3, %c0_4], %2 {strides = array<i32>} : memref<16x128xf32, #tpu.memory_space<vmem>>, vector<16x128xf32>,
    return
  }
}

</mosaic_0001>

<bundles_post_ra>
// kernel: linear_projection.1
= control target key start
LH: loop header
LB: loop body
LE: loop exit
PB: predicated region body
PF: predicated region fallthrough
CT: control target
= control target key end

     0   :  { %7 = vsyncpa [#allocation3], 0  ;;  %s356_s0 = inlined_call_operand.hbm [shape: f32[16,256], index: 0, kind: input, shape index: {}]   ;;  %s357_s1 = inlined_call_operand.hbm [shape: f32[128,256], index: 1, kind: input, shape index: {}]   ;;  %s358_s2 = inlined_call_operand.hbm [shape: f32[16,128], index: 2, kind: output, shape index: {}]  }
   0x1   :  { %8 = vsyncpa [#allocation6], 0 }
   0x2   :  { %9 = vsyncpa [#allocation4], 0  ;;  %s298_s9 = smov [#allocation2]   ;;  %s226_s13 = scalar_lea.hbm %s356_s0, 512 }
   0x3   :  { %s15_s10 = sshll.u32 %s298_s9, 4  ;;  %p227_p0 = scmp.ne.s32.totalorder %s356_s0, %s226_s13  ;;  %s16_s10 = int_to_ptr.vmem [resolvable:$true] %s15_s10 }
   0x4   :  { %p230_p1 = scmp.lt.u32.totalorder %s226_s13, %s356_s0 }
   0x6   :  { %p232_p2 = pnand %p230_p1, %p227_p0 }
   0x8   :  { %235 = shalt.err (!%p232_p2)
}
   0x9   :  { %s236_s18 = scalar_lea.vmem %s16_s10, 512  ;;  %p241_p4 = scmp.lt.s32.totalorder %s16_s10, %s16_s10 }
   0xa   :  { %p237_p3 = scmp.ne.s32.totalorder %s16_s10, %s236_s18  ;;  %p242_p5 = scmp.lt.s32.totalorder %s236_s18, %s236_s18 }
   0xc   :  { %p243_p6 = por %p242_p5, %p241_p4 }
   0xe   :  { %p244_p7 = pnand %p243_p6, %p237_p3 }
  0x10   :  { %247 = shalt.err (!%p244_p7)
}
  0x11   :  { %s299_s19 = smov 256   ;;  %s300_s20 = smov 16  }
  0x12   :  { %21 = dma.hbm_to_vmem [thread:$0]  %s356_s0, 512, %s16_s10, [#allocation3], %s299_s19, %s299_s19, %s300_s20  }
  0x13   :  { %s301_s23 = smov [#allocation5]   ;;  %s248_s27 = scalar_lea.hbm %s357_s1, 4096 }
  0x14   :  { %s27_s24 = sshll.u32 %s301_s23, 4  ;;  %p249_p8 = scmp.ne.s32.totalorder %s357_s1, %s248_s27  ;;  %s28_s24 = int_to_ptr.vmem [resolvable:$true] %s27_s24 }
  0x15   :  { %p252_p9 = scmp.lt.u32.totalorder %s248_s27, %s357_s1 }
  0x17   :  { %p254_p10 = pnand %p252_p9, %p249_p8 }
  0x19   :  { %257 = shalt.err (!%p254_p10)
}
  0x1a   :  { %s258_s4 = scalar_lea.vmem %s28_s24, 4096  ;;  %p263_p12 = scmp.lt.s32.totalorder %s28_s24, %s28_s24 }
  0x1b   :  { %p259_p11 = scmp.ne.s32.totalorder %s28_s24, %s258_s4  ;;  %p264_p13 = scmp.lt.s32.totalorder %s258_s4, %s258_s4 }
  0x1d   :  { %p265_p0 = por %p264_p13, %p263_p12 }
  0x1f   :  { %p266_p1 = pnand %p265_p0, %p259_p11 }
  0x21   :  { %269 = shalt.err (!%p266_p1)
}
  0x22   :  { %33 = dma.hbm_to_vmem [thread:$0]  %s357_s1, 4096, %s28_s24, [#allocation6], %s299_s19, %s299_s19, %s300_s20  }
  0x23   :  { %292 = dma.done.wait [#allocation3], 512  }
  0x24   :  { %293 = vsyncadd [#allocation3], 4294966784 }
  0x25   :  { %294 = dma.done.wait [#allocation6], 4096  }
  0x26   :  { %295 = vsyncadd [#allocation6], 4294963200  ;;  %v45_v0 = vld [vmem:[#allocation5 + $0x8] sm:$0xff]  ;;  %v47_v1 = vld [vmem:[#allocation5 + $0x18] sm:$0xff]  ;;  %s302_s1 = smov [#allocation7]  }
  0x27   :  { %v44_v2 = vld [vmem:[#allocation5] sm:$0xff]  ;;  %v171_v3 = vpack.c.bf16 %v47_v1, %v45_v0  ;;  %v46_v4 = vld [vmem:[#allocation5 + $0x10] sm:$0xff]  ;;  %v49_v5 = vld [vmem:[#allocation5 + $0x28] sm:$0xff]  ;;  %s158_s6 = sshll.u32 %s302_s1, 4  ;;  %s159_s6 = int_to_ptr.vmem [resolvable:$true] %s158_s6 }
  0x28   :  { %v51_v6 = vld [vmem:[#allocation5 + $0x38] sm:$0xff]  ;;  %v173_v7 = vpack.c.bf16 %v46_v4, %v44_v2  ;;  %v48_v9 = vld [vmem:[#allocation5 + $0x20] sm:$0xff]  ;;  %v50_v10 = vld [vmem:[#allocation5 + $0x30] sm:$0xff]  ;;  %s270_s7 = scalar_lea.vmem %s159_s6, 256  ;;  %p275_p3 = scmp.lt.s32.totalorder %s159_s6, %s159_s6 }
  0x29   :  { %v175_v8 = vpack.c.bf16 %v51_v6, %v49_v5  ;;  %172 = vmatprep.subr.bf16.mxu0 %v171_v3  ;;  %203 = vmatprep.subr.bf16.mxu1 %v171_v3  ;;  %v53_v11 = vld [vmem:[#allocation5 + $0x48] sm:$0xff]  ;;  %v55_v12 = vld [vmem:[#allocation5 + $0x58] sm:$0xff]  ;;  %v177_v13 = vpack.c.bf16 %v50_v10, %v48_v9  ;;  %v52_v17 = vld [vmem:[#allocation5 + $0x40] sm:$0xff]  ;;  %p271_p2 = scmp.ne.s32.totalorder %s159_s6, %s270_s7  ;;  %p276_p4 = scmp.lt.s32.totalorder %s270_s7, %s270_s7 }
  0x2a   :  { %174 = vmatpush1.bf16.xpose.msra.mxu0 %v173_v7  ;;  %211 = vmatpush1.bf16.xpose.msra.mxu1 %v173_v7  ;;  %v179_v14 = vpack.c.bf16 %v55_v12, %v53_v11  ;;  %v41_v15 = vld [vmem:[#allocation2 + $0x8] sm:$0xff]  ;;  %v43_v16 = vld [vmem:[#allocation2 + $0x18] sm:$0xff]  ;;  %v54_v18 = vld [vmem:[#allocation5 + $0x50] sm:$0xff] }
  0x2b   :  { %176 = vmatprep.subr.bf16.mxu0 %v175_v8  ;;  %204 = vmatprep.subr.bf16.mxu1 %v175_v8  ;;  %v57_v19 = vld [vmem:[#allocation5 + $0x68] sm:$0xff]  ;;  %v59_v20 = vld [vmem:[#allocation5 + $0x78] sm:$0xff]  ;;  %v181_v21 = vpack.c.bf16 %v54_v18, %v52_v17  ;;  %v56_v23 = vld [vmem:[#allocation5 + $0x60] sm:$0xff]  ;;  %p277_p5 = por %p276_p4, %p275_p3 }
  0x2c   :  { %140 = vmatprep.mubr.f32.mxu0 %v41_v15  ;;  %145 = vmatprep.mubr.f32.mxu1 %v43_v16  ;;  %v183_v22 = vpack.c.bf16 %v59_v20, %v57_v19  ;;  %v58_v24 = vld [vmem:[#allocation5 + $0x70] sm:$0xff]  ;;  %v61_v25 = vld [vmem:[#allocation5 + $0x88] sm:$0xff]  ;;  %v63_v26 = vld [vmem:[#allocation5 + $0x98] sm:$0xff] }
  0x2d   :  { %v185_v27 = vpack.c.bf16 %v58_v24, %v56_v23  ;;  %v187_v28 = vpack.c.bf16 %v63_v26, %v61_v25  ;;  %v60_v29 = vld [vmem:[#allocation5 + $0x80] sm:$0xff]  ;;  %v62_v30 = vld [vmem:[#allocation5 + $0x90] sm:$0xff]  ;;  %v65_v31 = vld [vmem:[#allocation5 + $0xa8] sm:$0xff]  ;;  %p278_p6 = pnand %p277_p5, %p271_p2 }
  0x2e   :  { %v67_v32 = vld [vmem:[#allocation5 + $0xb8] sm:$0xff]  ;;  %v189_v33 = vpack.c.bf16 %v62_v30, %v60_v29  ;;  %v64_v35 = vld [vmem:[#allocation5 + $0xa0] sm:$0xff]  ;;  %v66_v36 = vld [vmem:[#allocation5 + $0xb0] sm:$0xff] }
  0x2f   :  { %v191_v34 = vpack.c.bf16 %v67_v32, %v65_v31  ;;  %v69_v37 = vld [vmem:[#allocation5 + $0xc8] sm:$0xff]  ;;  %v71_v38 = vld [vmem:[#allocation5 + $0xd8] sm:$0xff]  ;;  %v193_v39 = vpack.c.bf16 %v66_v36, %v64_v35  ;;  %v68_v41 = vld [vmem:[#allocation5 + $0xc0] sm:$0xff] }
  0x30   :  { %v195_v40 = vpack.c.bf16 %v71_v38, %v69_v37  ;;  %v70_v42 = vld [vmem:[#allocation5 + $0xd0] sm:$0xff]  ;;  %v73_v43 = vld [vmem:[#allocation5 + $0xe8] sm:$0xff]  ;;  %v75_v44 = vld [vmem:[#allocation5 + $0xf8] sm:$0xff] }
  0x31   :  { %v197_v45 = vpack.c.bf16 %v70_v42, %v68_v41  ;;  %v199_v46 = vpack.c.bf16 %v75_v44, %v73_v43  ;;  %v72_v47 = vld [vmem:[#allocation5 + $0xe0] sm:$0xff]  ;;  %v74_v48 = vld [vmem:[#allocation5 + $0xf0] sm:$0xff] }
  0x32   :  { %178 = vmatpush1.bf16.xpose.msra.mxu0 %v177_v13  ;;  %212 = vmatpush1.bf16.xpose.msra.mxu1 %v177_v13  ;;  %v201_v49 = vpack.c.bf16 %v74_v48, %v72_v47  ;;  %v40_v50 = vld [vmem:[#allocation2] sm:$0xff]  ;;  %v42_v51 = vld [vmem:[#allocation2 + $0x10] sm:$0xff] }
  0x33   :  { %180 = vmatprep.subr.bf16.mxu0 %v179_v14  ;;  %205 = vmatprep.subr.bf16.mxu1 %v179_v14 }
  0x3a   :  { %182 = vmatpush1.bf16.xpose.msra.mxu0 %v181_v21  ;;  %213 = vmatpush1.bf16.xpose.msra.mxu1 %v181_v21 }
  0x3b   :  { %184 = vmatprep.subr.bf16.mxu0 %v183_v22  ;;  %206 = vmatprep.subr.bf16.mxu1 %v183_v22 }
  0x42   :  { %186 = vmatpush1.bf16.xpose.msra.mxu0 %v185_v27  ;;  %214 = vmatpush1.bf16.xpose.msra.mxu1 %v185_v27 }
  0x43   :  { %188 = vmatprep.subr.bf16.mxu0 %v187_v28  ;;  %207 = vmatprep.subr.bf16.mxu1 %v187_v28 }
  0x4a   :  { %190 = vmatpush1.bf16.xpose.msra.mxu0 %v189_v33  ;;  %215 = vmatpush1.bf16.xpose.msra.mxu1 %v189_v33 }
  0x4b   :  { %192 = vmatprep.subr.bf16.mxu0 %v191_v34  ;;  %208 = vmatprep.subr.bf16.mxu1 %v191_v34 }
  0x52   :  { %194 = vmatpush1.bf16.xpose.msra.mxu0 %v193_v39  ;;  %216 = vmatpush1.bf16.xpose.msra.mxu1 %v193_v39 }
  0x53   :  { %196 = vmatprep.subr.bf16.mxu0 %v195_v40  ;;  %209 = vmatprep.subr.bf16.mxu1 %v195_v40 }
  0x5a   :  { %198 = vmatpush1.bf16.xpose.msra.mxu0 %v197_v45  ;;  %217 = vmatpush1.bf16.xpose.msra.mxu1 %v197_v45 }
  0x5b   :  { %200 = vmatprep.subr.bf16.mxu0 %v199_v46  ;;  %210 = vmatprep.subr.bf16.mxu1 %v199_v46 }
  0x62   :  { %202 = vmatpush1.bf16.xpose.msra.mxu0 %v201_v49  ;;  %218 = vmatpush1.bf16.xpose.msra.mxu1 %v201_v49 }
  0x69   :  { %141 = vmatmul.mubr.f32.vlgmr.msra.gmra.mrb[0].mxu0 %v40_v50  ;;  %146 = vmatmul.mubr.f32.vlgmr.msra.gmra.mrb[0].mxu1 %v42_v51 }
 0x13c   :  { %v142_v52 = vpop.f32.mrb[0].mxu0  ;;  %v147_v53 = vpop.f32.mrb[0].mxu1 }
 0x13d   :  { %151 = vst [vmem:[#allocation7] sm:$0xff] %v142_v52  ;;  %152 = vst [vmem:[#allocation7 + $0x8] sm:$0xff] %v147_v53  ;;  %v144_v54 = vpop.f32.mrb[1].mxu0  ;;  %v149_v55 = vpop.f32.mrb[1].mxu1 }
 0x13e   :  { %281 = shalt.err (!%p278_p6)
}
 0x13f   :  { %s282_s10 = scalar_lea.hbm %s358_s2, 256 }
 0x140   :  { %p283_p7 = scmp.ne.s32.totalorder %s358_s2, %s282_s10  ;;  %p286_p8 = scmp.lt.u32.totalorder %s282_s10, %s358_s2 }
 0x142   :  { %p288_p9 = pnand %p286_p8, %p283_p7 }
 0x144   :  { %291 = shalt.err (!%p288_p9)
}
 0x145   :  { %s303_s15 = smov 128   ;;  %s304_s16 = smov 8  }
 0x146   :  { %164 = dma.vmem_to_hbm [thread:$0]  %s159_s6, 256, %s358_s2, [#allocation4], %s303_s15, %s303_s15, %s304_s16  }
 0x147   :  { %296 = dma.done.wait [#allocation4], 256  }
 0x148   :  { %297 = vsyncadd [#allocation4], 4294967040 }
 0x149   :  { %168 = vsyncpa [#allocation3], 1 }
 0x14a   :  { %169 = vsyncpa [#allocation6], 1 }
 0x14b   :  { %170 = vsyncpa [#allocation4], 1 }

</bundles_post_ra>
